<compile_context>
chip_gen: v7x
topology: tpu7x:2x2x1
jax: 0.10.0
libtpu: 0.0.40
codegen_flags: <defaults>
</compile_context>

<pallas_src>
import math
import functools

import jax
import jax.numpy as jnp
from jax import lax
from jax.experimental import pallas as pl
from jax.experimental.pallas import tpu as pltpu


def _round_up(x, m):
    return ((x + m - 1) // m) * m


# ----------------------------------------------------------------------------
# Kernels
# ----------------------------------------------------------------------------
def _gcn_agg_kernel(a_ref, h_ref, innorm_ref, b_ref, o_ref, acc_ref):
    """in_feats > out_feats branch: H = (X * out_norm) @ W precomputed.

    out = (A @ H) * in_norm + bias
    """
    k = pl.program_id(1)

    @pl.when(k == 0)
    def _():
        acc_ref[...] = jnp.zeros_like(acc_ref)

    acc_ref[...] += jnp.dot(a_ref[...], h_ref[...],
                            preferred_element_type=jnp.float32)

    @pl.when(k == pl.num_programs(1) - 1)
    def _():
        rst = acc_ref[...] * innorm_ref[...] + b_ref[...]
        o_ref[...] = rst.astype(o_ref.dtype)


def _gcn_agg_matmul_kernel(a_ref, x_ref, w_ref, innorm_ref, b_ref, o_ref, acc_ref):
    """in_feats <= out_feats branch (aggregate first, then matmul with W).

    out = ((A @ X_norm) @ W) * in_norm + bias
    """
    k = pl.program_id(1)

    @pl.when(k == 0)
    def _():
        acc_ref[...] = jnp.zeros_like(acc_ref)

    acc_ref[...] += jnp.dot(a_ref[...], x_ref[...],
                            preferred_element_type=jnp.float32)

    @pl.when(k == pl.num_programs(1) - 1)
    def _():
        rst = jnp.dot(acc_ref[...], w_ref[...],
                      preferred_element_type=jnp.float32)
        rst = rst * innorm_ref[...] + b_ref[...]
        o_ref[...] = rst.astype(o_ref.dtype)


# ----------------------------------------------------------------------------
# Wrapper
# ----------------------------------------------------------------------------
def gcn_layer(adj, feat, weight, bias, *,
              block_m=256, block_k=512, compute_dtype=jnp.bfloat16):
    """Forward pass of GCNLayer(norm='both', weight=True, bias=True)."""
    n, in_feats = feat.shape
    out_feats = weight.shape[1]
    out_dtype = feat.dtype

    # TODO(synk): the module's allow_zero_in_degree=False host-side check
    # (raise KeyError on zero in-degree nodes) is not replicated here.

    # --- degree normalization (norm='both'), precomputed once in XLA --------
    adj_f32 = adj.astype(jnp.float32)
    out_deg = jnp.maximum(jnp.sum(adj_f32, axis=0), 1.0)   # out-degree of src
    in_deg = jnp.maximum(jnp.sum(adj_f32, axis=1), 1.0)    # in-degree of dst
    out_norm = lax.rsqrt(out_deg)                          # [N]
    in_norm = lax.rsqrt(in_deg)[:, None]                   # [N, 1]

    # Fold the source-side normalization into the feature rows.
    #   A @ (diag(out_norm) @ X)  ==  (A * out_norm[None,:]) @ X
    # but costs only O(N*F) instead of O(N^2).
    feat_src = feat.astype(jnp.float32) * out_norm[:, None]

    # --- tiling / padding ----------------------------------------------------
    n_align = _round_up(n, 128)
    if n_align >= max(block_m, block_k):
        tm, tk = block_m, block_k
        n_pad = _round_up(n, math.lcm(tm, tk))
    else:
        tm = tk = n_align
        n_pad = n_align

    f_in_pad = _round_up(in_feats, 128)
    f_out_pad = _round_up(out_feats, 128)

    # Adjacency is exactly 0/1 -> bf16 is lossless; halves HBM traffic of the
    # dominant A stream and feeds the bf16 MXU directly.
    a = jnp.pad(adj_f32, ((0, n_pad - n), (0, n_pad - n))).astype(compute_dtype)
    in_norm_p = jnp.pad(in_norm, ((0, n_pad - n), (0, 0)), constant_values=1.0)
    bias_p = jnp.pad(bias.astype(jnp.float32),
                     (0, f_out_pad - out_feats)).reshape(1, f_out_pad)

    a_spec = pl.BlockSpec((tm, tk), lambda i, k: (i, k))
    innorm_spec = pl.BlockSpec((tm, 1), lambda i, k: (i, 0))
    bias_spec = pl.BlockSpec((1, f_out_pad), lambda i, k: (0, 0))
    out_spec = pl.BlockSpec((tm, f_out_pad), lambda i, k: (i, 0))

    if in_feats > out_feats:
        # Module order: feat_src = feat_src @ W, then aggregate.
        # X @ W is O(N*F_in*F_out) -> hoist to XLA so the kernel only streams A.
        h = jnp.dot(feat_src, weight.astype(jnp.float32),
                    preferred_element_type=jnp.float32)
        h = jnp.pad(h, ((0, n_pad - n), (0, f_out_pad - out_feats)))
        h = h.astype(compute_dtype)

        kernel = _gcn_agg_kernel
        in_specs = [a_spec,
                    pl.BlockSpec((tk, f_out_pad), lambda i, k: (k, 0)),
                    innorm_spec, bias_spec]
        operands = (a, h, in_norm_p, bias_p)
        acc_shape = (tm, f_out_pad)
    else:
        # Module order: aggregate first, then matmul with W (done at finalize).
        x = jnp.pad(feat_src, ((0, n_pad - n), (0, f_in_pad - in_feats)))
        x = x.astype(compute_dtype)
        w = jnp.pad(weight.astype(jnp.float32),
                    ((0, f_in_pad - in_feats), (0, f_out_pad - out_feats)))

        kernel = _gcn_agg_matmul_kernel
        in_specs = [a_spec,
                    pl.BlockSpec((tk, f_in_pad), lambda i, k: (k, 0)),
                    pl.BlockSpec((f_in_pad, f_out_pad), lambda i, k: (0, 0)),
                    innorm_spec, bias_spec]
        operands = (a, x, w, in_norm_p, bias_p)
        acc_shape = (tm, f_in_pad)

    out = pl.pallas_call(
        kernel,
        out_shape=jax.ShapeDtypeStruct((n_pad, f_out_pad), out_dtype),
        grid=(n_pad // tm, n_pad // tk),
        in_specs=in_specs,
        out_specs=out_spec,
        scratch_shapes=[pltpu.VMEM(acc_shape, jnp.float32)],
        compiler_params=pltpu.CompilerParams(
            dimension_semantics=("parallel", "arbitrary"),
            vmem_limit_bytes=32 * 1024 * 1024),
    )(*operands)

    return out[:n, :out_feats]


# ----------------------------------------------------------------------------
# Pure-JAX reference (follows the PyTorch/DGL module line by line, f32)
# ----------------------------------------------------------------------------
def gcn_reference(adj, feat, weight, bias):
    out_deg = jnp.maximum(jnp.sum(adj, axis=0), 1.0)   # out_degrees().clamp(min=1)
    in_deg = jnp.maximum(jnp.sum(adj, axis=1), 1.0)    # in_degrees().clamp(min=1)
    feat_src = feat * (out_deg ** -0.5)[:, None]
    if feat.shape[1] > weight.shape[1]:
        rst = adj @ (feat_src @ weight)
    else:
        rst = (adj @ feat_src) @ weight
    rst = rst * (in_deg ** -0.5)[:, None]
    return rst + bias[None, :]


if __name__ == "__main__":
    key = jax.random.PRNGKey(0)
    keys = jax.random.split(key, 6)

    def make_graph(k_adj, n, density=0.05):
        adj = (jax.random.uniform(k_adj, (n, n)) < density).astype(jnp.float32)
        # self-loops guarantee no 0-in-degree nodes (as dgl.add_self_loop would)
        return jnp.maximum(adj, jnp.eye(n, dtype=jnp.float32))

    def make_params(k_w, in_feats, out_feats):
        # reset_parameters(): xavier_uniform_ weight, zeros bias
        bound = (6.0 / (in_feats + out_feats)) ** 0.5
        w = jax.random.uniform(k_w, (in_feats, out_feats), jnp.float32,
                               minval=-bound, maxval=bound)
        b = jnp.zeros((out_feats,), jnp.float32)
        return w, b

    # --- case 1: in_feats <= out_feats (aggregate-then-matmul branch) -------
    N1, IN1, OUT1 = 200, 8, 32          # N not a multiple of 128 -> exercises padding/tiling
    adj1 = make_graph(keys[0], N1)
    feat1 = jax.random.normal(keys[1], (N1, IN1), dtype=jnp.float32)
    w1, b1 = make_params(keys[2], IN1, OUT1)

    out1 = jax.block_until_ready(gcn_layer(adj1, feat1, w1, b1))
    ref1 = gcn_reference(adj1, feat1, w1, b1)
    assert out1.shape == (N1, OUT1)
    assert jnp.allclose(out1, ref1, atol=3e-2, rtol=3e-2), "branch in<=out mismatch"

    # --- case 2: in_feats > out_feats (matmul-then-aggregate branch) --------
    N2, IN2, OUT2 = 200, 48, 16
    adj2 = make_graph(keys[3], N2)
    feat2 = jax.random.normal(keys[4], (N2, IN2), dtype=jnp.float32)
    w2, b2 = make_params(keys[5], IN2, OUT2)

    out2 = jax.block_until_ready(gcn_layer(adj2, feat2, w2, b2))
    ref2 = gcn_reference(adj2, feat2, w2, b2)
    assert out2.shape == (N2, OUT2)
    assert jnp.allclose(out2, ref2, atol=3e-2, rtol=3e-2), "branch in>out mismatch"

    print("KERNEL_OK")
</pallas_src>

<mosaic_0001>
module attributes {stable_mosaic.version = 11 : i64} {
  func.func @_gcn_agg_matmul_kernel(%arg0: i32, %arg1: i32, %arg2: memref<256x256xbf16, #tpu.memory_space<vmem>>, %arg3: memref<256x128xbf16, #tpu.memory_space<vmem>>, %arg4: memref<128x128xf32, #tpu.memory_space<vmem>>, %arg5: memref<256x1xf32, #tpu.memory_space<vmem>>, %arg6: memref<1x128xf32, #tpu.memory_space<vmem>>, %arg7: memref<256x128xf32, #tpu.memory_space<vmem>>, %arg8: memref<256x128xf32, #tpu.memory_space<vmem>>) attributes {dimension_semantics = [#tpu.dimension_semantics<parallel>, #tpu.dimension_semantics<arbitrary>], iteration_bounds = array<i64: 1, 1>, scalar_prefetch = 0 : i64, scratch_operands = 1 : i64, tpu.core_type = #tpu.core_type<tc>, window_params = [{transform_indices = @transform_0, window_bounds = array<i64: 256, 256>}, {transform_indices = @transform_1, window_bounds = array<i64: 256, 128>}, {pipeline_mode = #tpu.pipeline_mode<synchronous>, transform_indices = @transform_2, window_bounds = array<i64: 128, 128>}, {transform_indices = @transform_3, window_bounds = array<i64: 256, 1>}, {pipeline_mode = #tpu.pipeline_mode<synchronous>, transform_indices = @transform_4, window_bounds = array<i64: 1, 128>}, {transform_indices = @transform_5, window_bounds = array<i64: 256, 128>}]} {
    %c0_i32 = arith.constant 0 : i32
    %0 = arith.cmpi eq, %arg1, %c0_i32 : i32
    %1 = arith.extui %0 : i1 to i32
    %c0_i32_0 = arith.constant 0 : i32
    %2 = arith.cmpi ne, %1, %c0_i32_0 : i32
    scf.if %2 {
      %cst_10 = arith.constant 0.000000e+00 : f32
      %12 = vector.broadcast %cst_10 : f32 to vector<256x128xf32>
      %c0_11 = arith.constant 0 : index
      %c0_12 = arith.constant 0 : index
      %13 = vector.load %arg8[%c0_11, %c0_12] : memref<256x128xf32, #tpu.memory_space<vmem>>, vector<256x128xf32>
      tpu.vector_store %arg8[%c0_11, %c0_12], %12 {strides = array<i32>} : memref<256x128xf32, #tpu.memory_space<vmem>>, vector<256x128xf32>,
    } else {
    }
    %c0 = arith.constant 0 : index
    %c0_1 = arith.constant 0 : index
    %3 = vector.load %arg8[%c0, %c0_1] : memref<256x128xf32, #tpu.memory_space<vmem>>, vector<256x128xf32>
    %c0_2 = arith.constant 0 : index
    %c0_3 = arith.constant 0 : index
    %4 = vector.load %arg2[%c0_2, %c0_3] : memref<256x256xbf16, #tpu.memory_space<vmem>>, vector<256x256xbf16>
    %c0_4 = arith.constant 0 : index
    %c0_5 = arith.constant 0 : index
    %5 = vector.load %arg3[%c0_4, %c0_5] : memref<256x128xbf16, #tpu.memory_space<vmem>>, vector<256x128xbf16>
    %cst = arith.constant dense<0.000000e+00> : vector<256x128xf32>
    %6 = tpu.matmul %4, %5, %cst {dimension_numbers = #tpu.dot_dimension_numbers<[1], [0], [0], [1], [0, 0, 1, 1], [], []>} : vector<256x256xbf16>, vector<256x128xbf16>, vector<256x128xf32> -> vector<256x128xf32>
    %7 = arith.addf %3, %6 : vector<256x128xf32>
    %c0_6 = arith.constant 0 : index
    %c0_7 = arith.constant 0 : index
    %8 = vector.load %arg8[%c0_6, %c0_7] : memref<256x128xf32, #tpu.memory_space<vmem>>, vector<256x128xf32>
    tpu.vector_store %arg8[%c0_6, %c0_7], %7 {strides = array<i32>} : memref<256x128xf32, #tpu.memory_space<vmem>>, vector<256x128xf32>,
    %c0_i32_8 = arith.constant 0 : i32
    %9 = arith.cmpi eq, %arg1, %c0_i32_8 : i32
    %10 = arith.extui %9 : i1 to i32
    %c0_i32_9 = arith.constant 0 : i32
    %11 = arith.cmpi ne, %10, %c0_i32_9 : i32
    scf.if %11 {
      %c0_10 = arith.constant 0 : index
      %c0_11 = arith.constant 0 : index
      %12 = vector.load %arg8[%c0_10, %c0_11] : memref<256x128xf32, #tpu.memory_space<vmem>>, vector<256x128xf32>
      %c0_12 = arith.constant 0 : index
      %c0_13 = arith.constant 0 : index
      %13 = vector.load %arg4[%c0_12, %c0_13] : memref<128x128xf32, #tpu.memory_space<vmem>>, vector<128x128xf32>
      %cst_14 = arith.constant dense<0.000000e+00> : vector<256x128xf32>
      %14 = tpu.matmul %12, %13, %cst_14 {dimension_numbers = #tpu.dot_dimension_numbers<[1], [0], [0], [1], [0, 0, 1, 1], [], []>} : vector<256x128xf32>, vector<128x128xf32>, vector<256x128xf32> -> vector<256x128xf32>
      %c0_15 = arith.constant 0 : index
      %c0_16 = arith.constant 0 : index
      %15 = vector.load %arg5[%c0_15, %c0_16] : memref<256x1xf32, #tpu.memory_space<vmem>>, vector<256x1xf32>
      %16 = vector.broadcast %15 : vector<256x1xf32> to vector<256x128xf32>
      %17 = arith.mulf %14, %16 : vector<256x128xf32>
      %c0_17 = arith.constant 0 : index
      %c0_18 = arith.constant 0 : index
      %18 = vector.load %arg6[%c0_17, %c0_18] : memref<1x128xf32, #tpu.memory_space<vmem>>, vector<1x128xf32>
      %19 = vector.broadcast %18 : vector<1x128xf32> to vector<256x128xf32>
      %20 = arith.addf %17, %19 : vector<256x128xf32>
      %c0_19 = arith.constant 0 : index
      %c0_20 = arith.constant 0 : index
      %21 = vector.load %arg7[%c0_19, %c0_20] : memref<256x128xf32, #tpu.memory_space<vmem>>, vector<256x128xf32>
      tpu.vector_store %arg7[%c0_19, %c0_20], %20 {strides = array<i32>} : memref<256x128xf32, #tpu.memory_space<vmem>>, vector<256x128xf32>,
    } else {
    }
    return
  }
  func.func @transform_0(%arg0: i32, %arg1: i32) -> (i32, i32) {
    %c0_i32 = arith.constant 0 : i32
    return %arg0, %arg1 : i32, i32
  }
  func.func @transform_1(%arg0: i32, %arg1: i32) -> (i32, i32) {
    %c0_i32 = arith.constant 0 : i32
    %c0_i32_0 = arith.constant 0 : i32
    return %arg1, %c0_i32 : i32, i32
  }
  func.func @transform_2(%arg0: i32, %arg1: i32) -> (i32, i32) {
    %c0_i32 = arith.constant 0 : i32
    %c0_i32_0 = arith.constant 0 : i32
    %c0_i32_1 = arith.constant 0 : i32
    return %c0_i32, %c0_i32_0 : i32, i32
  }
  func.func @transform_3(%arg0: i32, %arg1: i32) -> (i32, i32) {
    %c0_i32 = arith.constant 0 : i32
    %c0_i32_0 = arith.constant 0 : i32
    return %arg0, %c0_i32 : i32, i32
  }
  func.func @transform_4(%arg0: i32, %arg1: i32) -> (i32, i32) {
    %c0_i32 = arith.constant 0 : i32
    %c0_i32_0 = arith.constant 0 : i32
    %c0_i32_1 = arith.constant 0 : i32
    return %c0_i32, %c0_i32_0 : i32, i32
  }
  func.func @transform_5(%arg0: i32, %arg1: i32) -> (i32, i32) {
    %c0_i32 = arith.constant 0 : i32
    %c0_i32_0 = arith.constant 0 : i32
    return %arg0, %c0_i32 : i32, i32
  }
}

</mosaic_0001>

<bundles_post_ra>
// kernel: tpu_custom_call.1
= control target key start
LH: loop header
LB: loop body
LE: loop exit
PB: predicated region body
PF: predicated region fallthrough
CT: control target
= control target key end

     0   :  { %10 = vsyncpa [#allocation4], 0  ;;  %s2068_s0 = inlined_call_operand.vmem [shape: bf16[256,256], index: 0, kind: input, shape index: {}]   ;;  %s2069_s1 = inlined_call_operand.hbm [shape: bf16[256,128], index: 1, kind: input, shape index: {}]   ;;  %s2070_s2 = inlined_call_operand.hbm [shape: f32[128,128], index: 2, kind: input, shape index: {}]   ;;  %s2071_s3 = inlined_call_operand.vmem [shape: f32[256,1], index: 3, kind: input, shape index: {}]   ;;  %s2072_s4 = inlined_call_operand.vmem [shape: f32[1,128], index: 4, kind: input, shape index: {}]   ;;  %s2073_s5 = inlined_call_operand.hbm [shape: f32[256,128], index: 5, kind: output, shape index: {}]  }
   0x1   :  { %11 = vsyncpa [#allocation7], 0 }
   0x2   :  { %12 = vsyncpa [#allocation5], 0  ;;  %s1735_s18 = smov [#allocation3]   ;;  %s1663_s22 = scalar_lea.hbm %s2069_s1, 2048 }
   0x3   :  { %s20_s19 = sshll.u32 %s1735_s18, 4  ;;  %p1664_p0 = scmp.ne.s32.totalorder %s2069_s1, %s1663_s22  ;;  %s21_s19 = int_to_ptr.vmem [resolvable:$true] %s20_s19 }
   0x4   :  { %p1667_p1 = scmp.lt.u32.totalorder %s1663_s22, %s2069_s1 }
   0x6   :  { %p1669_p2 = pnand %p1667_p1, %p1664_p0 }
   0x8   :  { %1672 = shalt.err (!%p1669_p2)
}
   0x9   :  { %s1673_s27 = scalar_lea.vmem %s21_s19, 2048  ;;  %p1678_p4 = scmp.lt.s32.totalorder %s21_s19, %s21_s19 }
   0xa   :  { %p1674_p3 = scmp.ne.s32.totalorder %s21_s19, %s1673_s27  ;;  %p1679_p5 = scmp.lt.s32.totalorder %s1673_s27, %s1673_s27 }
   0xc   :  { %p1680_p6 = por %p1679_p5, %p1678_p4 }
   0xe   :  { %p1681_p7 = pnand %p1680_p6, %p1674_p3 }
  0x10   :  { %1684 = shalt.err (!%p1681_p7)
}
  0x11   :  { %s1736_s28 = smov 64   ;;  %s1737_s29 = smov 4  }
  0x12   :  { %26 = dma.hbm_to_vmem [thread:$0]  %s2069_s1, 2048, %s21_s19, [#allocation4], %s1736_s28, %s1736_s28, %s1737_s29  }
  0x13   :  { %s1738_s7 = smov [#allocation6]   ;;  %s1685_s11 = scalar_lea.hbm %s2070_s2, 2048 }
  0x14   :  { %s32_s8 = sshll.u32 %s1738_s7, 4  ;;  %p1686_p8 = scmp.ne.s32.totalorder %s2070_s2, %s1685_s11  ;;  %s33_s8 = int_to_ptr.vmem [resolvable:$true] %s32_s8 }
  0x15   :  { %p1689_p9 = scmp.lt.u32.totalorder %s1685_s11, %s2070_s2 }
  0x17   :  { %p1691_p10 = pnand %p1689_p9, %p1686_p8 }
  0x19   :  { %1694 = shalt.err (!%p1691_p10)
}
  0x1a   :  { %s1695_s16 = scalar_lea.vmem %s33_s8, 2048  ;;  %p1700_p12 = scmp.lt.s32.totalorder %s33_s8, %s33_s8 }
  0x1b   :  { %p1696_p11 = scmp.ne.s32.totalorder %s33_s8, %s1695_s16  ;;  %p1701_p13 = scmp.lt.s32.totalorder %s1695_s16, %s1695_s16 }
  0x1d   :  { %p1702_p0 = por %p1701_p13, %p1700_p12 }
  0x1f   :  { %p1703_p1 = pnand %p1702_p0, %p1696_p11 }
  0x21   :  { %1706 = shalt.err (!%p1703_p1)
}
  0x22   :  { %s1739_s1 = smov 128   ;;  %s1740_s17 = smov 8  }
  0x23   :  { %38 = dma.hbm_to_vmem [thread:$0]  %s2070_s2, 2048, %s33_s8, [#allocation7], %s1739_s1, %s1739_s1, %s1740_s17  }
  0x24   :  { %1729 = dma.done.wait [#allocation4], 2048  }
  0x25   :  { %1730 = vsyncadd [#allocation4], 4294965248 }
  0x26   :  { %1731 = dma.done.wait [#allocation7], 2048  }
  0x27   :  { %1732 = vsyncadd [#allocation7], 4294965248  ;;  %v1599_v0 = vld [vmem:[#allocation3 + $0x40] sm:$0xff]   ;;  %v1601_v2 = vld [vmem:[#allocation3 + $0x48] sm:$0xff]  }
  0x28   :  { %v1600_v1 = vld [vmem:[#allocation3] sm:$0xff]   ;;  %1301 = vmatprep.subr.bf16.mxu0 %v1599_v0  ;;  %1573 = vmatprep.subr.bf16.mxu1 %v1599_v0  ;;  %v1602_v3 = vld [vmem:[#allocation3 + $0x8] sm:$0xff]   ;;  %v1603_v4 = vld [vmem:[#allocation3 + $0x50] sm:$0xff]  }
  0x29   :  { %1302 = vmatpush3.bf16.msra.mxu0 %v1600_v1  ;;  %1581 = vmatpush3.bf16.msra.mxu1 %v1600_v1  ;;  %v1604_v5 = vld [vmem:[#allocation3 + $0x10] sm:$0xff]   ;;  %v1605_v6 = vld [vmem:[#allocation3 + $0x58] sm:$0xff]   ;;  %v1607_v8 = vld [vmem:[#allocation3 + $0x60] sm:$0xff]  }
  0x2a   :  { %1303 = vmatprep.subr.bf16.mxu0 %v1601_v2  ;;  %1574 = vmatprep.subr.bf16.mxu1 %v1601_v2  ;;  %v1606_v7 = vld [vmem:[#allocation3 + $0x18] sm:$0xff]   ;;  %v1608_v9 = vld [vmem:[#allocation3 + $0x20] sm:$0xff]   ;;  %v1609_v10 = vld [vmem:[#allocation3 + $0x68] sm:$0xff]  }
  0x2b   :  { %v1617_v11 = vld [vmem:[%s2068_s0 + $0x4] ss:$8 sps:$4 sm:$0xff]   ;;  %v1611_v13 = vld [vmem:[#allocation3 + $0x70] sm:$0xff]   ;;  %v1613_v15 = vld [vmem:[#allocation3 + $0x78] sm:$0xff]  }
  0x2c   :  { %v1610_v12 = vld [vmem:[#allocation3 + $0x28] sm:$0xff]   ;;  %470 = vmatprep.mubr.bf16.mxu0 %v1617_v11  ;;  %v1612_v14 = vld [vmem:[#allocation3 + $0x30] sm:$0xff]   ;;  %v1614_v16 = vld [vmem:[#allocation3 + $0x38] sm:$0xff]  }
  0x2d   :  { %1304 = vmatpush3.bf16.msra.mxu0 %v1602_v3  ;;  %1582 = vmatpush3.bf16.msra.mxu1 %v1602_v3  ;;  %v1615_v17 = vld [vmem:[%s2068_s0] ss:$8 sps:$4 sm:$0xff]   ;;  %v1647_v18 = vld [vmem:[%s2068_s0 + $0xc4] ss:$8 sps:$4 sm:$0xff]   ;;  %v1618_v19 = vld [vmem:[%s2068_s0 + $0x14] ss:$8 sps:$4 sm:$0xff]  }
  0x2e   :  { %1305 = vmatprep.subr.bf16.mxu0 %v1603_v4  ;;  %1575 = vmatprep.subr.bf16.mxu1 %v1603_v4  ;;  %v1645_v20 = vld [vmem:[%s2068_s0 + $0xc0] ss:$8 sps:$4 sm:$0xff]   ;;  %v1651_v21 = vld [vmem:[%s2068_s0 + $0xd4] ss:$8 sps:$4 sm:$0xff]   ;;  %v1620_v22 = vld [vmem:[%s2068_s0 + $0x10] ss:$8 sps:$4 sm:$0xff]  }
  0x2f   :  { %566 = vmatprep.mubr.bf16.mxu1 %v1647_v18  ;;  %v698_v23 = vld [vmem:[#allocation6] sm:$0xff]  ;;  %v699_v24 = vld [vmem:[#allocation6 + $0x8] sm:$0xff]  ;;  %v700_v27 = vld [vmem:[#allocation6 + $0x10] sm:$0xff] }
  0x30   :  { %v1621_v25 = vld [vmem:[%s2068_s0 + $0x24] ss:$8 sps:$4 sm:$0xff]   ;;  %v1541_v26 = vpack.c.bf16 %v699_v24, %v698_v23  ;;  %v701_v28 = vld [vmem:[#allocation6 + $0x18] sm:$0xff]  ;;  %v704_v35 = vld [vmem:[#allocation6 + $0x30] sm:$0xff] }
  0x31   :  { %1306 = vmatpush3.bf16.msra.mxu0 %v1604_v5  ;;  %1583 = vmatpush3.bf16.msra.mxu1 %v1604_v5  ;;  %v1653_v29 = vld [vmem:[%s2068_s0 + $0xd0] ss:$8 sps:$4 sm:$0xff]   ;;  %v1545_v30 = vpack.c.bf16 %v701_v28, %v700_v27  ;;  %v702_v31 = vld [vmem:[#allocation6 + $0x20] sm:$0xff]  ;;  %v703_v32 = vld [vmem:[#allocation6 + $0x28] sm:$0xff] }
  0x32   :  { %1307 = vmatprep.subr.bf16.mxu0 %v1605_v6  ;;  %1576 = vmatprep.subr.bf16.mxu1 %v1605_v6  ;;  %v1657_v33 = vld [vmem:[%s2068_s0 + $0xe4] ss:$8 sps:$4 sm:$0xff]   ;;  %v1549_v34 = vpack.c.bf16 %v703_v32, %v702_v31  ;;  %v705_v36 = vld [vmem:[#allocation6 + $0x38] sm:$0xff]  ;;  %v1623_v37 = vld [vmem:[%s2068_s0 + $0x20] ss:$8 sps:$4 sm:$0xff]  }
  0x33   :  { %v1624_v38 = vld [vmem:[%s2068_s0 + $0x34] ss:$8 sps:$4 sm:$0xff]   ;;  %v1553_v39 = vpack.c.bf16 %v705_v36, %v704_v35  ;;  %v1659_v40 = vld [vmem:[%s2068_s0 + $0xe0] ss:$8 sps:$4 sm:$0xff]   ;;  %v1626_v47 = vld [vmem:[%s2068_s0 + $0x30] ss:$8 sps:$4 sm:$0xff]  }
  0x34   :  { %v706_v41 = vld [vmem:[#allocation6 + $0x40] sm:$0xff]  ;;  %v707_v42 = vld [vmem:[#allocation6 + $0x48] sm:$0xff]  ;;  %v1660_v43 = vld [vmem:[%s2068_s0 + $0xf4] ss:$8 sps:$4 sm:$0xff]  }
  0x35   :  { %1308 = vmatpush3.bf16.msra.mxu0 %v1606_v7  ;;  %1584 = vmatpush3.bf16.msra.mxu1 %v1606_v7  ;;  %v1557_v44 = vpack.c.bf16 %v707_v42, %v706_v41  ;;  %v708_v45 = vld [vmem:[#allocation6 + $0x50] sm:$0xff]  ;;  %v709_v46 = vld [vmem:[#allocation6 + $0x58] sm:$0xff]  ;;  %v1627_v48 = vld [vmem:[%s2068_s0 + $0x44] ss:$8 sps:$4 sm:$0xff]  }
  0x36   :  { %1309 = vmatprep.subr.bf16.mxu0 %v1607_v8  ;;  %1577 = vmatprep.subr.bf16.mxu1 %v1607_v8  ;;  %v1561_v49 = vpack.c.bf16 %v709_v46, %v708_v45  ;;  %v1662_v50 = vld [vmem:[%s2068_s0 + $0xf0] ss:$8 sps:$4 sm:$0xff]   ;;  %v710_v51 = vld [vmem:[#allocation6 + $0x60] sm:$0xff]  ;;  %v711_v52 = vld [vmem:[#allocation6 + $0x68] sm:$0xff]  ;;  %v1741_v8 = vmov 0  }
  0x37   :  { %v1565_v53 = vpack.c.bf16 %v711_v52, %v710_v51  ;;  %v1629_v54 = vld [vmem:[%s2068_s0 + $0x40] ss:$8 sps:$4 sm:$0xff]   ;;  %v1630_v55 = vld [vmem:[%s2068_s0 + $0x54] ss:$8 sps:$4 sm:$0xff]   ;;  %v1632_v56 = vld [vmem:[%s2068_s0 + $0x50] ss:$8 sps:$4 sm:$0xff]   ;;  %1598 = vset.pattern.permute.xlu1 %v1741_v8  ;;  %1597 = vset.pattern.permute.xlu0 %v1741_v8 }
  0x38   :  { %v1633_v57 = vld [vmem:[%s2068_s0 + $0x64] ss:$8 sps:$4 sm:$0xff]   ;;  %v1635_v58 = vld [vmem:[%s2068_s0 + $0x60] ss:$8 sps:$4 sm:$0xff]   ;;  %v1636_v59 = vld [vmem:[%s2068_s0 + $0x74] ss:$8 sps:$4 sm:$0xff]  }
  0x39   :  { %1310 = vmatpush3.bf16.msra.mxu0 %v1608_v9  ;;  %1585 = vmatpush3.bf16.msra.mxu1 %v1608_v9  ;;  %v1638_v60 = vld [vmem:[%s2068_s0 + $0x70] ss:$8 sps:$4 sm:$0xff]   ;;  %v1639_v61 = vld [vmem:[%s2068_s0 + $0x84] ss:$8 sps:$4 sm:$0xff]   ;;  %v1641_v62 = vld [vmem:[%s2068_s0 + $0x80] ss:$8 sps:$4 sm:$0xff]  }
  0x3a   :  { %1311 = vmatprep.subr.bf16.mxu0 %v1609_v10  ;;  %1578 = vmatprep.subr.bf16.mxu1 %v1609_v10  ;;  %v1642_v63 = vld [vmem:[%s2068_s0 + $0x94] ss:$8 sps:$4 sm:$0xff]   ;;  %v1644_v0 = vld [vmem:[%s2068_s0 + $0x90] ss:$8 sps:$4 sm:$0xff]   ;;  %v1648_v1 = vld [vmem:[%s2068_s0 + $0xa4] ss:$8 sps:$4 sm:$0xff]  }
  0x3b   :  { %v1650_v2 = vld [vmem:[%s2068_s0 + $0xa0] ss:$8 sps:$4 sm:$0xff]   ;;  %v1654_v3 = vld [vmem:[%s2068_s0 + $0xb4] ss:$8 sps:$4 sm:$0xff]   ;;  %v1656_v7 = vld [vmem:[%s2068_s0 + $0xb0] ss:$8 sps:$4 sm:$0xff]  }
  0x3c   :  { %v712_v4 = vld [vmem:[#allocation6 + $0x70] sm:$0xff]  ;;  %v713_v5 = vld [vmem:[#allocation6 + $0x78] sm:$0xff]  ;;  %v939_v10 = vld [vmem:[%s2071_s3] sm:$0xff] }
  0x3d   :  { %1312 = vmatpush3.bf16.msra.mxu0 %v1610_v12  ;;  %1586 = vmatpush3.bf16.msra.mxu1 %v1610_v12  ;;  %v1569_v6 = vpack.c.bf16 %v713_v5, %v712_v4  ;;  %v941_v9 = vld [vmem:[%s2071_s3 + $0x10] sm:$0xff]  ;;  %v942_v11 = vld [vmem:[%s2071_s3 + $0x18] sm:$0xff]  ;;  %v940_v12 = vld [vmem:[%s2071_s3 + $0x8] sm:$0xff] }
  0x3e   :  { %1313 = vmatprep.subr.bf16.mxu0 %v1611_v13  ;;  %1579 = vmatprep.subr.bf16.mxu1 %v1611_v13  ;;  %v944_v13 = vld [vmem:[%s2071_s3 + $0x28] sm:$0xff]  ;;  %v947_v18 = vld [vmem:[%s2071_s3 + $0x40] sm:$0xff]  ;;  %v954_v23 = vld [vmem:[%s2071_s3 + $0x78] sm:$0xff] }
  0x3f   :  { %983 = vperm.xlu1 %1598, %v941_v9   ;;  %973 = vperm.xlu0 %1597, %v939_v10   ;;  %v953_v24 = vld [vmem:[%s2071_s3 + $0x70] sm:$0xff]  ;;  %v958_v27 = vld [vmem:[%s2071_s3 + $0x98] sm:$0xff] }
  0x40   :  { %v957_v28 = vld [vmem:[%s2071_s3 + $0x90] sm:$0xff]  ;;  %v962_v31 = vld [vmem:[%s2071_s3 + $0xb8] sm:$0xff] }
  0x41   :  { %1314 = vmatpush3.bf16.msra.mxu0 %v1612_v14  ;;  %1587 = vmatpush3.bf16.msra.mxu1 %v1612_v14  ;;  %v943_v14 = vld [vmem:[%s2071_s3 + $0x20] sm:$0xff]  ;;  %v961_v32 = vld [vmem:[%s2071_s3 + $0xb0] sm:$0xff]  ;;  %v966_v35 = vld [vmem:[%s2071_s3 + $0xd8] sm:$0xff] }
  0x42   :  { %1315 = vmatprep.subr.bf16.mxu0 %v1613_v15  ;;  %1580 = vmatprep.subr.bf16.mxu1 %v1613_v15  ;;  %v946_v15 = vld [vmem:[%s2071_s3 + $0x38] sm:$0xff]  ;;  %v965_v36 = vld [vmem:[%s2071_s3 + $0xd0] sm:$0xff] }
  0x43   :  { %988 = vperm.xlu1 %1598, %v942_v11   ;;  %978 = vperm.xlu0 %1597, %v940_v12   ;;  %v969_v51 = vld [vmem:[%s2071_s3 + $0xf0] sm:$0xff] }
  0x45   :  { %1316 = vmatpush3.bf16.msra.mxu0 %v1614_v16  ;;  %1588 = vmatpush3.bf16.msra.mxu1 %v1614_v16  ;;  %v945_v16 = vld [vmem:[%s2071_s3 + $0x30] sm:$0xff] }
  0x46   :  { %1542 = vmatprep.subr.bf16.mxu1 %v1541_v26 }
  0x47   :  { %998 = vperm.xlu1 %1598, %v944_v13   ;;  %993 = vperm.xlu0 %1597, %v943_v14  }
  0x48   :  { %471 = vmatmul.mubr.bf16.vlgmr.msra.gmra.mrb[0].mxu0 %v1615_v17  ;;  %567 = vmatmul.mubr.bf16.vlgmr.msra.gmra.mrb[0].mxu1 %v1645_v20  ;;  %v948_v17 = vld [vmem:[%s2071_s3 + $0x48] sm:$0xff]  ;;  %v949_v20 = vld [vmem:[%s2071_s3 + $0x50] sm:$0xff] }
  0x49   :  { %478 = vmatprep.mubr.bf16.mxu0 %v1618_v19  ;;  %574 = vmatprep.mubr.bf16.mxu1 %v1651_v21  ;;  %v950_v19 = vld [vmem:[%s2071_s3 + $0x58] sm:$0xff]  ;;  %v952_v21 = vld [vmem:[%s2071_s3 + $0x68] sm:$0xff] }
  0x4a   :  { %1544 = vmatpush3.bf16.msra.mxu1 %v1541_v26  ;;  %v955_v26 = vld [vmem:[%s2071_s3 + $0x80] sm:$0xff] }
  0x4b   :  { %1546 = vmatprep.subr.bf16.mxu1 %v1545_v30  ;;  %1008 = vperm.xlu1 %1598, %v946_v15  }
  0x4c   :  { %1003 = vperm.xlu0 %1597, %v945_v16  }
  0x4e   :  { %1548 = vmatpush3.bf16.msra.mxu1 %v1545_v30  ;;  %v959_v30 = vld [vmem:[%s2071_s3 + $0xa0] sm:$0xff] }
  0x4f   :  { %1550 = vmatprep.subr.bf16.mxu1 %v1549_v34  ;;  %1018 = vperm.xlu1 %1598, %v948_v17  }
  0x50   :  { %479 = vmatmul.mubr.bf16.gmra.mrb[4].mxu0 %v1620_v22  ;;  %575 = vmatmul.mubr.bf16.gmra.mrb[4].mxu1 %v1653_v29  ;;  %v951_v22 = vld [vmem:[%s2071_s3 + $0x60] sm:$0xff]  ;;  %v960_v29 = vld [vmem:[%s2071_s3 + $0xa8] sm:$0xff] }
  0x51   :  { %486 = vmatprep.mubr.bf16.mxu0 %v1621_v25  ;;  %582 = vmatprep.mubr.bf16.mxu1 %v1657_v33  ;;  %v956_v25 = vld [vmem:[%s2071_s3 + $0x88] sm:$0xff] }
  0x52   :  { %1552 = vmatpush3.bf16.msra.mxu1 %v1549_v34  ;;  %1013 = vperm.xlu0 %1597, %v947_v18   ;;  %v964_v33 = vld [vmem:[%s2071_s3 + $0xc8] sm:$0xff]  ;;  %v963_v34 = vld [vmem:[%s2071_s3 + $0xc0] sm:$0xff] }
  0x53   :  { %1554 = vmatprep.subr.bf16.mxu1 %v1553_v39  ;;  %1028 = vperm.xlu1 %1598, %v950_v19  }
  0x56   :  { %1556 = vmatpush3.bf16.msra.mxu1 %v1553_v39  ;;  %1023 = vperm.xlu0 %1597, %v949_v20   ;;  %v967_v39 = vld [vmem:[%s2071_s3 + $0xe0] sm:$0xff] }
  0x57   :  { %1558 = vmatprep.subr.bf16.mxu1 %v1557_v44  ;;  %1038 = vperm.xlu1 %1598, %v952_v21  }
  0x58   :  { %487 = vmatmul.mubr.bf16.gmra.mrb[8].mxu0 %v1623_v37  ;;  %583 = vmatmul.mubr.bf16.gmra.mrb[8].mxu1 %v1659_v40 }
  0x59   :  { %494 = vmatprep.mubr.bf16.mxu0 %v1624_v38  ;;  %590 = vmatprep.mubr.bf16.mxu1 %v1660_v43  ;;  %v968_v38 = vld [vmem:[%s2071_s3 + $0xe8] sm:$0xff] }
  0x5a   :  { %1560 = vmatpush3.bf16.msra.mxu1 %v1557_v44  ;;  %1033 = vperm.xlu0 %1597, %v951_v22  }
  0x5b   :  { %1562 = vmatprep.subr.bf16.mxu1 %v1561_v49  ;;  %1048 = vperm.xlu1 %1598, %v954_v23  }
  0x5e   :  { %1564 = vmatpush3.bf16.msra.mxu1 %v1561_v49  ;;  %1043 = vperm.xlu0 %1597, %v953_v24  }
  0x5f   :  { %1566 = vmatprep.subr.bf16.mxu1 %v1565_v53  ;;  %1058 = vperm.xlu1 %1598, %v956_v25  }
  0x60   :  { %495 = vmatmul.mubr.bf16.gmra.mrb[12].mxu0 %v1626_v47  ;;  %591 = vmatmul.mubr.bf16.gmra.mrb[12].mxu1 %v1662_v50  ;;  %v970_v50 = vld [vmem:[%s2071_s3 + $0xf8] sm:$0xff] }
  0x61   :  { %502 = vmatprep.mubr.bf16.mxu0 %v1627_v48 }
  0x62   :  { %1568 = vmatpush3.bf16.msra.mxu1 %v1565_v53  ;;  %1053 = vperm.xlu0 %1597, %v955_v26  }
  0x63   :  { %1570 = vmatprep.subr.bf16.mxu1 %v1569_v6  ;;  %1068 = vperm.xlu1 %1598, %v958_v27  }
  0x66   :  { %1572 = vmatpush3.bf16.msra.mxu1 %v1569_v6  ;;  %1063 = vperm.xlu0 %1597, %v957_v28  }
  0x67   :  { %1078 = vperm.xlu1 %1598, %v960_v29  }
  0x68   :  { %503 = vmatmul.mubr.bf16.gmra.mrb[16].mxu0 %v1629_v54 }
  0x69   :  { %510 = vmatprep.mubr.bf16.mxu0 %v1630_v55 }
  0x6a   :  { %1073 = vperm.xlu0 %1597, %v959_v30  }
  0x6b   :  { %1088 = vperm.xlu1 %1598, %v962_v31  }
  0x6e   :  { %1083 = vperm.xlu0 %1597, %v961_v32  }
  0x6f   :  { %1098 = vperm.xlu1 %1598, %v964_v33  }
  0x70   :  { %511 = vmatmul.mubr.bf16.gmra.mrb[20].mxu0 %v1632_v56 }
  0x71   :  { %518 = vmatprep.mubr.bf16.mxu0 %v1633_v57 }
  0x72   :  { %1093 = vperm.xlu0 %1597, %v963_v34  }
  0x73   :  { %1108 = vperm.xlu1 %1598, %v966_v35  }
  0x76   :  { %1103 = vperm.xlu0 %1597, %v965_v36  }
  0x77   :  { %1118 = vperm.xlu1 %1598, %v968_v38  }
  0x78   :  { %519 = vmatmul.mubr.bf16.gmra.mrb[24].mxu0 %v1635_v58 }
  0x79   :  { %526 = vmatprep.mubr.bf16.mxu0 %v1636_v59 }
  0x7a   :  { %1113 = vperm.xlu0 %1597, %v967_v39  }
  0x7b   :  { %1128 = vperm.xlu1 %1598, %v970_v50  }
  0x7e   :  { %1123 = vperm.xlu0 %1597, %v969_v51  }
  0x80   :  { %527 = vmatmul.mubr.bf16.gmra.mrb[28].mxu0 %v1638_v60 }
  0x81   :  { %534 = vmatprep.mubr.bf16.mxu0 %v1639_v61 }
  0x88   :  { %535 = vmatmul.mubr.bf16.gmra.mrb[32].mxu0 %v1641_v62 }
  0x89   :  { %542 = vmatprep.mubr.bf16.mxu0 %v1642_v63 }
  0x90   :  { %543 = vmatmul.mubr.bf16.gmra.mrb[36].mxu0 %v1644_v0 }
  0x91   :  { %550 = vmatprep.mubr.bf16.mxu0 %v1648_v1 }
  0x98   :  { %551 = vmatmul.mubr.bf16.gmra.mrb[40].mxu0 %v1650_v2 }
  0x99   :  { %558 = vmatprep.mubr.bf16.mxu0 %v1654_v3 }
  0xa0   :  { %559 = vmatmul.mubr.bf16.gmra.mrb[44].mxu0 %v1656_v7 }
 0x11b   :  { %v1317_v37 = vpop.f32.mrb[0].mxu0  ;;  %v1389_v41 = vpop.f32.mrb[0].mxu1 }
 0x11c   :  { %v1318_v40 = vpop.f32.mrb[1].mxu0  ;;  %v1390_v44 = vpop.f32.mrb[1].mxu1 }
 0x11d   :  { %v1319_v42 = vadd.f32 %v1318_v40, %v1317_v37  ;;  %v1320_v43 = vpop.f32.mrb[2].mxu0  ;;  %v1986_v46 = vadd.f32 %v1390_v44, %v1389_v41  ;;  %v1392_v47 = vpop.f32.mrb[2].mxu1 }
 0x11e   :  { %v1321_v45 = vpop.f32.mrb[3].mxu0  ;;  %v1393_v49 = vpop.f32.mrb[3].mxu1 }
 0x11f   :  { %v1322_v48 = vadd.f32 %v1321_v45, %v1320_v43  ;;  %1493 = vmatprep.mubr.f32.mxu1 %v1319_v42  ;;  %v1994_v52 = vadd.f32 %v1393_v49, %v1392_v47 }
 0x121   :  { %1494 = vmatmul.mubr.f32.vlgmr.msra.gmra.mrb[16].mxu1 %v1322_v48 }
 0x123   :  { %v1323_v53 = vpop.f32.mrb[4].mxu0  ;;  %v1395_v55 = vpop.f32.mrb[4].mxu1 }
 0x124   :  { %v1324_v54 = vpop.f32.mrb[5].mxu0  ;;  %v1396_v58 = vpop.f32.mrb[5].mxu1 }
 0x125   :  { %v1325_v56 = vadd.f32 %v1324_v54, %v1323_v53  ;;  %v1326_v57 = vpop.f32.mrb[6].mxu0  ;;  %v1996_v60 = vadd.f32 %v1396_v58, %v1395_v55  ;;  %v1398_v61 = vpop.f32.mrb[6].mxu1 }
 0x126   :  { %v1327_v59 = vpop.f32.mrb[7].mxu0  ;;  %v1399_v63 = vpop.f32.mrb[7].mxu1 }
 0x127   :  { %v1328_v62 = vadd.f32 %v1327_v59, %v1326_v57  ;;  %1496 = vmatprep.mubr.f32.mxu1 %v1325_v56  ;;  %v1998_v0 = vadd.f32 %v1399_v63, %v1398_v61 }
 0x129   :  { %1497 = vmatmul.mubr.f32.gmra.mrb[18].mxu1 %v1328_v62 }
 0x12b   :  { %v1329_v1 = vpop.f32.mrb[8].mxu0  ;;  %v1401_v3 = vpop.f32.mrb[8].mxu1 }
 0x12c   :  { %v1330_v2 = vpop.f32.mrb[9].mxu0  ;;  %v1402_v6 = vpop.f32.mrb[9].mxu1 }
 0x12d   :  { %v1331_v4 = vadd.f32 %v1330_v2, %v1329_v1  ;;  %v1332_v5 = vpop.f32.mrb[10].mxu0  ;;  %v2000_v8 = vadd.f32 %v1402_v6, %v1401_v3  ;;  %v1404_v9 = vpop.f32.mrb[10].mxu1 }
 0x12e   :  { %v1333_v7 = vpop.f32.mrb[11].mxu0  ;;  %v1405_v11 = vpop.f32.mrb[11].mxu1 }
 0x12f   :  { %v1334_v10 = vadd.f32 %v1333_v7, %v1332_v5  ;;  %1499 = vmatprep.mubr.f32.mxu1 %v1331_v4  ;;  %v2002_v12 = vadd.f32 %v1405_v11, %v1404_v9 }
 0x131   :  { %1500 = vmatmul.mubr.f32.gmra.mrb[20].mxu1 %v1334_v10 }
 0x133   :  { %v1335_v13 = vpop.f32.mrb[12].mxu0  ;;  %v1407_v15 = vpop.f32.mrb[12].mxu1 }
 0x134   :  { %v1336_v14 = vpop.f32.mrb[13].mxu0  ;;  %v1408_v18 = vpop.f32.mrb[13].mxu1 }
 0x135   :  { %v1337_v16 = vadd.f32 %v1336_v14, %v1335_v13  ;;  %v1338_v17 = vpop.f32.mrb[14].mxu0  ;;  %v2004_v20 = vadd.f32 %v1408_v18, %v1407_v15  ;;  %v1410_v21 = vpop.f32.mrb[14].mxu1 }
 0x136   :  { %v1339_v19 = vpop.f32.mrb[15].mxu0  ;;  %v1411_v23 = vpop.f32.mrb[15].mxu1 }
 0x137   :  { %v1340_v22 = vadd.f32 %v1339_v19, %v1338_v17  ;;  %1502 = vmatprep.mubr.f32.mxu1 %v1337_v16  ;;  %v2006_v24 = vadd.f32 %v1411_v23, %v1410_v21  ;;  %v974_v15 = vpop.permute.xlu0 %973  ;;  %v984_v18 = vpop.permute.xlu1 %983 }
 0x139   :  { %1503 = vmatmul.mubr.f32.gmra.mrb[22].mxu1 %v1340_v22 }
 0x13b   :  { %v1341_v25 = vpop.f32.mrb[16].mxu0  ;;  %v979_v16 = vpop.permute.xlu0 %978 }
 0x13c   :  { %v1342_v26 = vpop.f32.mrb[17].mxu0  ;;  %v989_v19 = vpop.permute.xlu1 %988 }
 0x13d   :  { %v1343_v27 = vadd.f32 %v1342_v26, %v1341_v25  ;;  %v1344_v28 = vpop.f32.mrb[18].mxu0 }
 0x13e   :  { %v1345_v29 = vpop.f32.mrb[19].mxu0 }
 0x13f   :  { %v1346_v30 = vadd.f32 %v1345_v29, %v1344_v28  ;;  %1505 = vmatprep.mubr.f32.mxu1 %v1343_v27  ;;  %v994_v28 = vpop.permute.xlu0 %993 }
 0x140   :  { %v999_v26 = vpop.permute.xlu1 %998 }
 0x141   :  { %1506 = vmatmul.mubr.f32.gmra.mrb[24].mxu1 %v1346_v30 }
 0x143   :  { %v1347_v31 = vpop.f32.mrb[20].mxu0 }
 0x144   :  { %v1348_v32 = vpop.f32.mrb[21].mxu0 }
 0x145   :  { %v1349_v33 = vadd.f32 %v1348_v32, %v1347_v31  ;;  %v1350_v34 = vpop.f32.mrb[22].mxu0 }
 0x146   :  { %v1351_v35 = vpop.f32.mrb[23].mxu0 }
 0x147   :  { %v1352_v36 = vadd.f32 %v1351_v35, %v1350_v34  ;;  %1508 = vmatprep.mubr.f32.mxu1 %v1349_v33  ;;  %v1009_v34 = vpop.permute.xlu1 %1008 }
 0x149   :  { %1509 = vmatmul.mubr.f32.gmra.mrb[26].mxu1 %v1352_v36  ;;  %v1004_v36 = vpop.permute.xlu0 %1003 }
 0x14b   :  { %v1353_v37 = vpop.f32.mrb[24].mxu0 }
 0x14c   :  { %v1354_v38 = vpop.f32.mrb[25].mxu0 }
 0x14d   :  { %v1355_v39 = vadd.f32 %v1354_v38, %v1353_v37  ;;  %v1356_v40 = vpop.f32.mrb[26].mxu0 }
 0x14e   :  { %v1357_v41 = vpop.f32.mrb[27].mxu0 }
 0x14f   :  { %v1358_v42 = vadd.f32 %v1357_v41, %v1356_v40  ;;  %1511 = vmatprep.mubr.f32.mxu1 %v1355_v39 }
 0x151   :  { %1512 = vmatmul.mubr.f32.gmra.mrb[28].mxu1 %v1358_v42  ;;  %v1019_v42 = vpop.permute.xlu1 %1018 }
 0x153   :  { %v1359_v43 = vpop.f32.mrb[28].mxu0 }
 0x154   :  { %v1360_v44 = vpop.f32.mrb[29].mxu0 }
 0x155   :  { %v1361_v45 = vadd.f32 %v1360_v44, %v1359_v43  ;;  %v1362_v47 = vpop.f32.mrb[30].mxu0  ;;  %v1014_v44 = vpop.permute.xlu0 %1013 }
 0x156   :  { %v1363_v48 = vpop.f32.mrb[31].mxu0 }
 0x157   :  { %v1364_v49 = vadd.f32 %v1363_v48, %v1362_v47  ;;  %1514 = vmatprep.mubr.f32.mxu1 %v1361_v45 }
 0x159   :  { %1515 = vmatmul.mubr.f32.gmra.mrb[30].mxu1 %v1364_v49 }
 0x15b   :  { %v1365_v50 = vpop.f32.mrb[32].mxu0 }
 0x15c   :  { %v1366_v51 = vpop.f32.mrb[33].mxu0 }
 0x15d   :  { %v1367_v53 = vadd.f32 %v1366_v51, %v1365_v50  ;;  %v1368_v54 = vpop.f32.mrb[34].mxu0  ;;  %v1029_v51 = vpop.permute.xlu1 %1028 }
 0x15e   :  { %v1369_v55 = vpop.f32.mrb[35].mxu0 }
 0x15f   :  { %v1370_v56 = vadd.f32 %v1369_v55, %v1368_v54  ;;  %1517 = vmatprep.mubr.f32.mxu1 %v1367_v53  ;;  %v1024_v54 = vpop.permute.xlu0 %1023 }
 0x161   :  { %1518 = vmatmul.mubr.f32.gmra.mrb[32].mxu1 %v1370_v56 }
 0x163   :  { %v1371_v57 = vpop.f32.mrb[36].mxu0 }
 0x164   :  { %v1372_v58 = vpop.f32.mrb[37].mxu0 }
 0x165   :  { %v1373_v59 = vadd.f32 %v1372_v58, %v1371_v57  ;;  %v1374_v61 = vpop.f32.mrb[38].mxu0 }
 0x166   :  { %v1375_v62 = vpop.f32.mrb[39].mxu0 }
 0x167   :  { %v1376_v63 = vadd.f32 %v1375_v62, %v1374_v61  ;;  %1520 = vmatprep.mubr.f32.mxu1 %v1373_v59  ;;  %v1039_v61 = vpop.permute.xlu1 %1038 }
 0x169   :  { %1521 = vmatmul.mubr.f32.gmra.mrb[34].mxu1 %v1376_v63  ;;  %v1034_v63 = vpop.permute.xlu0 %1033 }
 0x16b   :  { %v1377_v1 = vpop.f32.mrb[40].mxu0 }
 0x16c   :  { %v1378_v2 = vpop.f32.mrb[41].mxu0 }
 0x16d   :  { %v1379_v3 = vadd.f32 %v1378_v2, %v1377_v1  ;;  %v1380_v4 = vpop.f32.mrb[42].mxu0 }
 0x16e   :  { %v1381_v5 = vpop.f32.mrb[43].mxu0 }
 0x16f   :  { %v1382_v6 = vadd.f32 %v1381_v5, %v1380_v4  ;;  %1523 = vmatprep.mubr.f32.mxu1 %v1379_v3 }
 0x171   :  { %1524 = vmatmul.mubr.f32.gmra.mrb[36].mxu1 %v1382_v6  ;;  %v1049_v6 = vpop.permute.xlu1 %1048 }
 0x173   :  { %v1383_v7 = vpop.f32.mrb[44].mxu0 }
 0x174   :  { %v1384_v9 = vpop.f32.mrb[45].mxu0 }
 0x175   :  { %v1385_v10 = vadd.f32 %v1384_v9, %v1383_v7  ;;  %v1386_v11 = vpop.f32.mrb[46].mxu0  ;;  %v1044_v9 = vpop.permute.xlu0 %1043 }
 0x176   :  { %v1387_v13 = vpop.f32.mrb[47].mxu0 }
 0x177   :  { %v1388_v14 = vadd.f32 %v1387_v13, %v1386_v11  ;;  %1526 = vmatprep.mubr.f32.mxu1 %v1385_v10 }
 0x179   :  { %1527 = vmatmul.mubr.f32.gmra.mrb[38].mxu1 %v1388_v14 }
 0x17a   :  { %1529 = vmatprep.mubr.f32.mxu1 %v1986_v46  ;;  %v2019_v46 = vld [vmem:[%s2072_s4] ss:$0 sm:$0xff]  ;;  %s1742_s4 = smov [#allocation8]  }
 0x17b   :  { %s1239_s20 = sshll.u32 %s1742_s4, 4  ;;  %s1240_s20 = int_to_ptr.vmem [resolvable:$true] %s1239_s20 }
 0x17c   :  { %s1707_s21 = scalar_lea.vmem %s1240_s20, 4096  ;;  %p1712_p3 = scmp.lt.s32.totalorder %s1240_s20, %s1240_s20 }
 0x17d   :  { %1530 = vmatmul.mubr.f32.gmra.mrb[40].mxu1 %v1994_v52  ;;  %p1708_p2 = scmp.ne.s32.totalorder %s1240_s20, %s1707_s21  ;;  %p1713_p4 = scmp.lt.s32.totalorder %s1707_s21, %s1707_s21 }
 0x17e   :  { %1532 = vmatprep.mubr.f32.mxu1 %v1996_v60 }
 0x17f   :  { %p1714_p5 = por %p1713_p4, %p1712_p3 }
 0x181   :  { %1533 = vmatmul.mubr.f32.gmra.mrb[42].mxu1 %v1998_v0  ;;  %p1715_p6 = pnand %p1714_p5, %p1708_p2 }
 0x182   :  { %1535 = vmatprep.mubr.f32.mxu1 %v2000_v8 }
 0x185   :  { %1536 = vmatmul.mubr.f32.gmra.mrb[44].mxu1 %v2002_v12 }
 0x186   :  { %1538 = vmatprep.mubr.f32.mxu1 %v2004_v20 }
 0x189   :  { %1539 = vmatmul.mubr.f32.gmra.mrb[46].mxu1 %v2006_v24 }
 0x1f4   :  { %v1495_v17 = vpop.f32.mrb[16].mxu1 }
 0x1f5   :  { %v1132_v52 = vmul.f32 %v1495_v17, %v979_v16  ;;  %v780_v60 = vpop.f32.mrb[17].mxu1  ;;  %v1059_v16 = vpop.permute.xlu1 %1058 }
 0x1f6   :  { %v1131_v0 = vmul.f32 %v974_v15, %v780_v60  ;;  %v1054_v17 = vpop.permute.xlu0 %1053 }
 0x1f7   :  { %v1171_v8 = vadd.f32 %v2019_v46, %v1132_v52 }
 0x1f8   :  { %v1170_v12 = vadd.f32 %v2019_v46, %v1131_v0 }
 0x1f9   :  { %1203 = vst [vmem:[#allocation8 + $0x8] sm:$0xff] %v1171_v8 }
 0x1fa   :  { %1202 = vst [vmem:[#allocation8] sm:$0xff] %v1170_v12  ;;  %v1069_v12 = vpop.permute.xlu1 %1068 }
 0x1fc   :  { %v1498_v20 = vpop.f32.mrb[18].mxu1 }
 0x1fd   :  { %v1134_v21 = vmul.f32 %v1498_v20, %v989_v19  ;;  %v790_v22 = vpop.f32.mrb[19].mxu1  ;;  %v1064_v20 = vpop.permute.xlu0 %1063 }
 0x1fe   :  { %v1133_v23 = vmul.f32 %v984_v18, %v790_v22 }
 0x1ff   :  { %v1173_v24 = vadd.f32 %v2019_v46, %v1134_v21 }
 0x200   :  { %v1172_v25 = vadd.f32 %v2019_v46, %v1133_v23 }
 0x201   :  { %1205 = vst [vmem:[#allocation8 + $0x18] sm:$0xff] %v1173_v24  ;;  %v1079_v24 = vpop.permute.xlu1 %1078 }
 0x202   :  { %1204 = vst [vmem:[#allocation8 + $0x10] sm:$0xff] %v1172_v25 }
 0x204   :  { %v1501_v27 = vpop.f32.mrb[20].mxu1 }
 0x205   :  { %v1136_v29 = vmul.f32 %v1501_v27, %v999_v26  ;;  %v800_v30 = vpop.f32.mrb[21].mxu1  ;;  %v1074_v26 = vpop.permute.xlu0 %1073 }
 0x206   :  { %v1135_v31 = vmul.f32 %v994_v28, %v800_v30 }
 0x207   :  { %v1175_v32 = vadd.f32 %v2019_v46, %v1136_v29  ;;  %v1089_v29 = vpop.permute.xlu1 %1088 }
 0x208   :  { %v1174_v33 = vadd.f32 %v2019_v46, %v1135_v31 }
 0x209   :  { %1207 = vst [vmem:[#allocation8 + $0x28] sm:$0xff] %v1175_v32  ;;  %v1084_v31 = vpop.permute.xlu0 %1083 }
 0x20a   :  { %1206 = vst [vmem:[#allocation8 + $0x20] sm:$0xff] %v1174_v33 }
 0x20c   :  { %v1504_v35 = vpop.f32.mrb[22].mxu1 }
 0x20d   :  { %v1138_v37 = vmul.f32 %v1504_v35, %v1009_v34  ;;  %v810_v38 = vpop.f32.mrb[23].mxu1 }
 0x20e   :  { %v1137_v39 = vmul.f32 %v1004_v36, %v810_v38  ;;  %v1094_v38 = vpop.permute.xlu0 %1093 }
 0x20f   :  { %v1177_v40 = vadd.f32 %v2019_v46, %v1138_v37  ;;  %v1099_v37 = vpop.permute.xlu1 %1098 }
 0x210   :  { %v1176_v41 = vadd.f32 %v2019_v46, %v1137_v39 }
 0x211   :  { %1209 = vst [vmem:[#allocation8 + $0x38] sm:$0xff] %v1177_v40 }
 0x212   :  { %1208 = vst [vmem:[#allocation8 + $0x30] sm:$0xff] %v1176_v41 }
 0x214   :  { %v1507_v43 = vpop.f32.mrb[24].mxu1 }
 0x215   :  { %v1140_v45 = vmul.f32 %v1507_v43, %v1019_v42  ;;  %v820_v47 = vpop.f32.mrb[25].mxu1 }
 0x216   :  { %v1139_v48 = vmul.f32 %v1014_v44, %v820_v47  ;;  %v1109_v44 = vpop.permute.xlu1 %1108 }
 0x217   :  { %v1179_v49 = vadd.f32 %v2019_v46, %v1140_v45 }
 0x218   :  { %v1178_v50 = vadd.f32 %v2019_v46, %v1139_v48  ;;  %v1104_v48 = vpop.permute.xlu0 %1103 }
 0x219   :  { %1211 = vst [vmem:[#allocation8 + $0x48] sm:$0xff] %v1179_v49 }
 0x21a   :  { %1210 = vst [vmem:[#allocation8 + $0x40] sm:$0xff] %v1178_v50 }
 0x21c   :  { %v1510_v53 = vpop.f32.mrb[26].mxu1 }
 0x21d   :  { %v1142_v55 = vmul.f32 %v1510_v53, %v1029_v51  ;;  %v830_v56 = vpop.f32.mrb[27].mxu1 }
 0x21e   :  { %v1141_v57 = vmul.f32 %v1024_v54, %v830_v56 }
 0x21f   :  { %v1181_v58 = vadd.f32 %v2019_v46, %v1142_v55 }
 0x220   :  { %v1180_v59 = vadd.f32 %v2019_v46, %v1141_v57 }
 0x221   :  { %1213 = vst [vmem:[#allocation8 + $0x58] sm:$0xff] %v1181_v58  ;;  %v1119_v58 = vpop.permute.xlu1 %1118 }
 0x222   :  { %1212 = vst [vmem:[#allocation8 + $0x50] sm:$0xff] %v1180_v59 }
 0x224   :  { %v1513_v62 = vpop.f32.mrb[28].mxu1 }
 0x225   :  { %v1144_v1 = vmul.f32 %v1513_v62, %v1039_v61  ;;  %v840_v2 = vpop.f32.mrb[29].mxu1  ;;  %v1114_v61 = vpop.permute.xlu0 %1113 }
 0x226   :  { %v1143_v3 = vmul.f32 %v1034_v63, %v840_v2 }
 0x227   :  { %v1183_v4 = vadd.f32 %v2019_v46, %v1144_v1 }
 0x228   :  { %v1182_v5 = vadd.f32 %v2019_v46, %v1143_v3 }
 0x229   :  { %1215 = vst [vmem:[#allocation8 + $0x68] sm:$0xff] %v1183_v4 }
 0x22a   :  { %1214 = vst [vmem:[#allocation8 + $0x60] sm:$0xff] %v1182_v5 }
 0x22c   :  { %v1516_v7 = vpop.f32.mrb[30].mxu1 }
 0x22d   :  { %v1146_v10 = vmul.f32 %v1516_v7, %v1049_v6  ;;  %v850_v11 = vpop.f32.mrb[31].mxu1  ;;  %v1129_v6 = vpop.permute.xlu1 %1128 }
 0x22e   :  { %v1145_v13 = vmul.f32 %v1044_v9, %v850_v11 }
 0x22f   :  { %v1185_v14 = vadd.f32 %v2019_v46, %v1146_v10  ;;  %v1124_v10 = vpop.permute.xlu0 %1123 }
 0x230   :  { %v1184_v15 = vadd.f32 %v2019_v46, %v1145_v13 }
 0x231   :  { %1217 = vst [vmem:[#allocation8 + $0x78] sm:$0xff] %v1185_v14 }
 0x232   :  { %1216 = vst [vmem:[#allocation8 + $0x70] sm:$0xff] %v1184_v15 }
 0x234   :  { %v1519_v52 = vpop.f32.mrb[32].mxu1 }
 0x235   :  { %v1148_v60 = vmul.f32 %v1519_v52, %v1059_v16  ;;  %v860_v18 = vpop.f32.mrb[33].mxu1 }
 0x236   :  { %v1147_v0 = vmul.f32 %v1054_v17, %v860_v18 }
 0x237   :  { %v1187_v8 = vadd.f32 %v2019_v46, %v1148_v60 }
 0x238   :  { %v1186_v19 = vadd.f32 %v2019_v46, %v1147_v0 }
 0x239   :  { %1219 = vst [vmem:[#allocation8 + $0x88] sm:$0xff] %v1187_v8 }
 0x23a   :  { %1218 = vst [vmem:[#allocation8 + $0x80] sm:$0xff] %v1186_v19 }
 0x23c   :  { %v1522_v21 = vpop.f32.mrb[34].mxu1 }
 0x23d   :  { %v1150_v22 = vmul.f32 %v1522_v21, %v1069_v12  ;;  %v870_v23 = vpop.f32.mrb[35].mxu1 }
 0x23e   :  { %v1149_v25 = vmul.f32 %v1064_v20, %v870_v23 }
 0x23f   :  { %v1189_v27 = vadd.f32 %v2019_v46, %v1150_v22 }
 0x240   :  { %v1188_v28 = vadd.f32 %v2019_v46, %v1149_v25 }
 0x241   :  { %1221 = vst [vmem:[#allocation8 + $0x98] sm:$0xff] %v1189_v27 }
 0x242   :  { %1220 = vst [vmem:[#allocation8 + $0x90] sm:$0xff] %v1188_v28 }
 0x244   :  { %v1525_v30 = vpop.f32.mrb[36].mxu1 }
 0x245   :  { %v1152_v32 = vmul.f32 %v1525_v30, %v1079_v24  ;;  %v880_v33 = vpop.f32.mrb[37].mxu1 }
 0x246   :  { %v1151_v34 = vmul.f32 %v1074_v26, %v880_v33 }
 0x247   :  { %v1191_v35 = vadd.f32 %v2019_v46, %v1152_v32 }
 0x248   :  { %v1190_v36 = vadd.f32 %v2019_v46, %v1151_v34 }
 0x249   :  { %1223 = vst [vmem:[#allocation8 + $0xa8] sm:$0xff] %v1191_v35 }
 0x24a   :  { %1222 = vst [vmem:[#allocation8 + $0xa0] sm:$0xff] %v1190_v36 }
 0x24c   :  { %v1528_v39 = vpop.f32.mrb[38].mxu1 }
 0x24d   :  { %v1154_v40 = vmul.f32 %v1528_v39, %v1089_v29  ;;  %v890_v41 = vpop.f32.mrb[39].mxu1 }
 0x24e   :  { %v1153_v42 = vmul.f32 %v1084_v31, %v890_v41 }
 0x24f   :  { %v1193_v43 = vadd.f32 %v2019_v46, %v1154_v40 }
 0x250   :  { %v1192_v45 = vadd.f32 %v2019_v46, %v1153_v42  ;;  %v1531_v47 = vpop.f32.mrb[40].mxu1 }
 0x251   :  { %1225 = vst [vmem:[#allocation8 + $0xb8] sm:$0xff] %v1193_v43  ;;  %v1156_v49 = vmul.f32 %v1531_v47, %v1099_v37  ;;  %v900_v50 = vpop.f32.mrb[41].mxu1 }
 0x252   :  { %1224 = vst [vmem:[#allocation8 + $0xb0] sm:$0xff] %v1192_v45  ;;  %v1155_v51 = vmul.f32 %v1094_v38, %v900_v50 }
 0x253   :  { %v1195_v53 = vadd.f32 %v2019_v46, %v1156_v49 }
 0x254   :  { %v1194_v54 = vadd.f32 %v2019_v46, %v1155_v51  ;;  %v1534_v55 = vpop.f32.mrb[42].mxu1 }
 0x255   :  { %1227 = vst [vmem:[#allocation8 + $0xc8] sm:$0xff] %v1195_v53  ;;  %v1158_v56 = vmul.f32 %v1534_v55, %v1109_v44  ;;  %v910_v57 = vpop.f32.mrb[43].mxu1 }
 0x256   :  { %1226 = vst [vmem:[#allocation8 + $0xc0] sm:$0xff] %v1194_v54  ;;  %v1157_v59 = vmul.f32 %v1104_v48, %v910_v57 }
 0x257   :  { %v1197_v62 = vadd.f32 %v2019_v46, %v1158_v56 }
 0x258   :  { %v1196_v63 = vadd.f32 %v2019_v46, %v1157_v59  ;;  %v1537_v1 = vpop.f32.mrb[44].mxu1 }
 0x259   :  { %1229 = vst [vmem:[#allocation8 + $0xd8] sm:$0xff] %v1197_v62  ;;  %v1160_v2 = vmul.f32 %v1537_v1, %v1119_v58  ;;  %v920_v3 = vpop.f32.mrb[45].mxu1 }
 0x25a   :  { %1228 = vst [vmem:[#allocation8 + $0xd0] sm:$0xff] %v1196_v63  ;;  %v1159_v4 = vmul.f32 %v1114_v61, %v920_v3 }
 0x25b   :  { %v1199_v5 = vadd.f32 %v2019_v46, %v1160_v2 }
 0x25c   :  { %v1198_v7 = vadd.f32 %v2019_v46, %v1159_v4  ;;  %v1540_v9 = vpop.f32.mrb[46].mxu1 }
 0x25d   :  { %1231 = vst [vmem:[#allocation8 + $0xe8] sm:$0xff] %v1199_v5  ;;  %v1162_v11 = vmul.f32 %v1540_v9, %v1129_v6  ;;  %v930_v13 = vpop.f32.mrb[47].mxu1 }
 0x25e   :  { %1230 = vst [vmem:[#allocation8 + $0xe0] sm:$0xff] %v1198_v7  ;;  %v1161_v14 = vmul.f32 %v1124_v10, %v930_v13 }
 0x25f   :  { %v1201_v15 = vadd.f32 %v2019_v46, %v1162_v11 }
 0x260   :  { %v1200_v16 = vadd.f32 %v2019_v46, %v1161_v14 }
 0x261   :  { %1233 = vst [vmem:[#allocation8 + $0xf8] sm:$0xff] %v1201_v15 }
 0x262   :  { %1232 = vst [vmem:[#allocation8 + $0xf0] sm:$0xff] %v1200_v16 }
 0x263   :  { %1718 = shalt.err (!%p1715_p6)
}
 0x264   :  { %s1719_s24 = scalar_lea.hbm %s2073_s5, 4096 }
 0x265   :  { %p1720_p7 = scmp.ne.s32.totalorder %s2073_s5, %s1719_s24  ;;  %p1723_p8 = scmp.lt.u32.totalorder %s1719_s24, %s2073_s5 }
 0x267   :  { %p1725_p9 = pnand %p1723_p8, %p1720_p7 }
 0x269   :  { %1728 = shalt.err (!%p1725_p9)
}
 0x26a   :  { %1245 = dma.vmem_to_hbm [thread:$0]  %s1240_s20, 4096, %s2073_s5, [#allocation5], %s1739_s1, %s1739_s1, %s1740_s17  }
 0x26b   :  { %1733 = dma.done.wait [#allocation5], 4096  }
 0x26c   :  { %1734 = vsyncadd [#allocation5], 4294963200 }
 0x26d   :  { %1249 = vsyncpa [#allocation4], 1 }
 0x26e   :  { %1250 = vsyncpa [#allocation7], 1 }
 0x26f   :  { %1251 = vsyncpa [#allocation5], 1 }

</bundles_post_ra>
